<compile_context>
chip_gen: v7x
topology: tpu7x:2x2x1
jax: 0.10.0
libtpu: 0.0.40
codegen_flags: <defaults>
</compile_context>

<pallas_src>
import numpy as np
import jax
import jax.numpy as jnp
from jax import lax
from jax.experimental import pallas as pl
from jax.experimental.pallas import tpu as pltpu


def gaussian_kernel_np(size, sigma=1.0, dtype=np.float32):
    """Same construction as the PyTorch `gaussian_kernel` (deterministic)."""
    ax = np.linspace(-(size[1] - 1) / 2.0, (size[1] - 1) / 2.0, size[1])
    ay = np.linspace(-(size[0] - 1) / 2.0, (size[0] - 1) / 2.0, size[0])
    xx, yy = np.meshgrid(ax, ay)
    kernel = np.exp(-0.5 * (np.square(xx) + np.square(yy)) / np.square(sigma))
    kernel /= np.sum(kernel)
    return kernel.astype(dtype)  # (kh, kw)


def _separable_gaussian_np(size, sigma=1.0):
    """1D factors ky (kh,) and kx (kw,) with outer(ky, kx) == normalized 2D kernel."""
    ax = np.linspace(-(size[1] - 1) / 2.0, (size[1] - 1) / 2.0, size[1])
    ay = np.linspace(-(size[0] - 1) / 2.0, (size[0] - 1) / 2.0, size[0])
    kx = np.exp(-0.5 * np.square(ax) / np.square(sigma))
    ky = np.exp(-0.5 * np.square(ay) / np.square(sigma))
    kx /= kx.sum()
    ky /= ky.sum()
    return ky.astype(np.float64), kx.astype(np.float64)


def _cdiv(a, b):
    return -(-a // b)


def _vmem_capacity_bytes():
    try:
        return int(pltpu.get_tpu_info().vmem_capacity_bytes)
    except Exception:
        return 64 * 1024 * 1024  # conservative default (v7x per-TensorCore)


def _pick_lane_tile(nlanes, per_lane_bytes, budget_bytes):
    """Lane (last-dim) block size.

    Must be the whole axis (when <= 128) or a multiple of 128 (BlockSpec
    (8,128) rule); ragged last block is fine because lanes are independent.
    """
    if nlanes <= 128:
        return nlanes, 1  # must take the full (small) axis
    groups_total = _cdiv(nlanes, 128)
    groups_fit = max(1, int(budget_bytes // max(1, per_lane_bytes * 128)))
    groups = min(groups_fit, groups_total)
    if groups >= groups_total:
        # Keep >= 2 grid steps: DMA/compute pipelining on all generations and
        # both TensorCores on v7x.
        groups = max(1, (groups_total + 1) // 2)
    lt = 128 * groups
    return lt, _cdiv(nlanes, lt)


def gaussian_pool_lanes_last(x, size=(3, 3), stride=(2, 2), sigma=1.0):
    """Core Pallas kernel.

    `x` is (H, W, L) with the fused batch*channel axis on the lane (last) dim;
    returns (H_out, W_out, L).  Calling this directly from channels-last
    producers/consumers avoids the NCHW layout plumbing entirely.
    """
    if isinstance(stride, int):
        stride = (stride, stride)
    H, W, L = x.shape
    kh, kw = size
    sh, sw = stride
    H_out = (H - kh) // sh + 1
    W_out = (W - kw) // sw + 1
    assert H_out > 0 and W_out > 0, "input smaller than kernel (padding=0)"

    ky, kx = _separable_gaussian_np(size, sigma)  # baked compile-time constants
    itemsize = jnp.dtype(x.dtype).itemsize

    # Per-lane working set actually kept live by the pipeline:
    #   double-buffered input tile + double-buffered output tile + f32 scratch.
    per_lane = (2 * H * W * itemsize
                + 2 * H_out * W_out * itemsize
                + H_out * W * 4)

    vmem_cap = _vmem_capacity_bytes()
    if vmem_cap >= 96 * 1024 * 1024:           # v5e / v6e: 128 MiB physical VMEM
        vmem_limit = 96 * 1024 * 1024
    else:                                      # v7x: 64 MiB per TensorCore
        vmem_limit = min(vmem_cap - 8 * 1024 * 1024, 48 * 1024 * 1024)
    headroom = 4 * 1024 * 1024                 # compiler temporaries

    LT, grid_l = _pick_lane_tile(L, per_lane, vmem_limit - headroom)

    # If even the minimum legal tile overflows the budget, raise the limit up
    # to physical VMEM rather than failing to compile.
    # TODO(synk): H-strip tiling with a (kh-1)-row stride-aligned halo for very
    # large planes with small L (needs manual DMA; Blocked specs cannot overlap).
    need = per_lane * LT + headroom
    vmem_limit = int(min(max(vmem_limit, need), vmem_cap))

    def _ds(start, length, s):
        return pl.ds(start, length) if s == 1 else pl.ds(start, length, stride=s)

    def kernel_fn(x_ref, o_ref, t_ref):
        # --- H direction (leading dim of the ref): stride-sh row slabs read
        # straight from the Ref (address math only), accumulated into the f32
        # VMEM scratch.  The whole input tile is never materialized.
        t_ref[...] = jnp.float32(ky[0]) * x_ref[_ds(0, H_out, sh), :, :].astype(jnp.float32)
        for dh in range(1, kh):
            t_ref[...] = t_ref[...] + (
                jnp.float32(ky[dh])
                * x_ref[_ds(dh, H_out, sh), :, :].astype(jnp.float32))

        # --- W direction (sublane dim): sublane-strided loads from the scratch
        # Ref; the short kw-term chain fuses per output vreg (no XLU shuffles,
        # no in-register strided slicing).
        acc = jnp.float32(kx[0]) * t_ref[:, _ds(0, W_out, sw), :]
        for dw in range(1, kw):
            acc = acc + jnp.float32(kx[dw]) * t_ref[:, _ds(dw, W_out, sw), :]
        o_ref[...] = acc.astype(o_ref.dtype)

    return pl.pallas_call(
        kernel_fn,
        out_shape=jax.ShapeDtypeStruct((H_out, W_out, L), x.dtype),
        grid=(grid_l,),
        in_specs=[pl.BlockSpec((H, W, LT), lambda i: (0, 0, i))],
        out_specs=pl.BlockSpec((H_out, W_out, LT), lambda i: (0, 0, i)),
        scratch_shapes=[pltpu.VMEM((H_out, W, LT), jnp.float32)],
        compiler_params=pltpu.CompilerParams(
            dimension_semantics=("parallel",),
            vmem_limit_bytes=vmem_limit),
    )(x)


def gaussian_pool(x, size=(3, 3), stride=(2, 2), sigma=1.0):
    """GaussianPool.forward for NCHW float input (matches the PyTorch module).

    TODO(synk): the NCHW<->(H, W, N*C) transposes below are pure layout
    plumbing (extra HBM passes); callers that can produce/consume channels-last
    should use `gaussian_pool_lanes_last` directly and skip them.
    """
    if isinstance(stride, int):
        stride = (stride, stride)
    N, C, H, W = x.shape
    xt = jnp.reshape(jnp.transpose(x, (2, 3, 0, 1)), (H, W, N * C))
    out_t = gaussian_pool_lanes_last(xt, size=size, stride=stride, sigma=sigma)
    H_out, W_out = out_t.shape[0], out_t.shape[1]
    out = jnp.reshape(out_t, (H_out, W_out, N, C))
    return jnp.transpose(out, (2, 3, 0, 1))  # (N, C, H_out, W_out)


def gaussian_pool_ref(x, size=(3, 3), stride=(2, 2), sigma=1.0):
    """Pure-JAX reference (depthwise conv with the full 2D kernel)."""
    if isinstance(stride, int):
        stride = (stride, stride)
    C = x.shape[1]
    kern = jnp.asarray(gaussian_kernel_np(size, sigma))          # (kh, kw)
    w = jnp.broadcast_to(kern[None, None], (C, 1, *size))        # (C, 1, kh, kw)
    return lax.conv_general_dilated(
        x, w, window_strides=stride, padding="VALID",
        dimension_numbers=("NCHW", "OIHW", "NCHW"),
        feature_group_count=C)


if __name__ == "__main__":
    key = jax.random.PRNGKey(0)
    N, C, H, W = 2, 4, 16, 16
    size = (3, 3)
    stride = (2, 2)

    x = jax.random.normal(key, (N, C, H, W), dtype=jnp.float32)

    out = gaussian_pool(x, size=size, stride=stride)
    out = jax.block_until_ready(out)

    ref = jax.block_until_ready(gaussian_pool_ref(x, size=size, stride=stride))
    assert out.shape == ref.shape, (out.shape, ref.shape)
    np.testing.assert_allclose(np.asarray(out), np.asarray(ref),
                               rtol=1e-5, atol=1e-5)

    print("KERNEL_OK")
</pallas_src>

<mosaic_0001>
module attributes {stable_mosaic.version = 11 : i64} {
  func.func @kernel_fn(%arg0: i32, %arg1: memref<16x16x8xf32, #tpu.memory_space<vmem>>, %arg2: memref<7x7x8xf32, #tpu.memory_space<vmem>>, %arg3: memref<7x16x8xf32, #tpu.memory_space<vmem>>) attributes {dimension_semantics = [#tpu.dimension_semantics<parallel>], iteration_bounds = array<i64: 1>, scalar_prefetch = 0 : i64, scratch_operands = 1 : i64, tpu.core_type = #tpu.core_type<tc>, window_params = [{transform_indices = @transform_0, window_bounds = array<i64: 16, 16, 8>}, {transform_indices = @transform_1, window_bounds = array<i64: 7, 7, 8>}]} {
    %c0 = arith.constant 0 : index
    %c0_0 = arith.constant 0 : index
    %c0_1 = arith.constant 0 : index
    %0 = tpu.strided_load %arg1[%c0, %c0_0, %c0_1] {strides = array<i32: 2, 1, 1>} : memref<16x16x8xf32, #tpu.memory_space<vmem>>, vector<7x16x8xf32>
    %cst = arith.constant 0.274068624 : f32
    %1 = vector.broadcast %cst : f32 to vector<7x16x8xf32>
    %2 = arith.mulf %1, %0 : vector<7x16x8xf32>
    %c0_2 = arith.constant 0 : index
    %c0_3 = arith.constant 0 : index
    %c0_4 = arith.constant 0 : index
    %3 = vector.load %arg3[%c0_2, %c0_3, %c0_4] : memref<7x16x8xf32, #tpu.memory_space<vmem>>, vector<7x16x8xf32>
    tpu.vector_store %arg3[%c0_2, %c0_3, %c0_4], %2 {strides = array<i32>} : memref<7x16x8xf32, #tpu.memory_space<vmem>>, vector<7x16x8xf32>,
    %c0_5 = arith.constant 0 : index
    %c0_6 = arith.constant 0 : index
    %c0_7 = arith.constant 0 : index
    %4 = vector.load %arg3[%c0_5, %c0_6, %c0_7] : memref<7x16x8xf32, #tpu.memory_space<vmem>>, vector<7x16x8xf32>
    %c1 = arith.constant 1 : index
    %c0_8 = arith.constant 0 : index
    %c0_9 = arith.constant 0 : index
    %5 = tpu.strided_load %arg1[%c1, %c0_8, %c0_9] {strides = array<i32: 2, 1, 1>} : memref<16x16x8xf32, #tpu.memory_space<vmem>>, vector<7x16x8xf32>
    %cst_10 = arith.constant 0.451862752 : f32
    %6 = vector.broadcast %cst_10 : f32 to vector<7x16x8xf32>
    %7 = arith.mulf %6, %5 : vector<7x16x8xf32>
    %8 = arith.addf %4, %7 : vector<7x16x8xf32>
    %c0_11 = arith.constant 0 : index
    %c0_12 = arith.constant 0 : index
    %c0_13 = arith.constant 0 : index
    %9 = vector.load %arg3[%c0_11, %c0_12, %c0_13] : memref<7x16x8xf32, #tpu.memory_space<vmem>>, vector<7x16x8xf32>
    tpu.vector_store %arg3[%c0_11, %c0_12, %c0_13], %8 {strides = array<i32>} : memref<7x16x8xf32, #tpu.memory_space<vmem>>, vector<7x16x8xf32>,
    %c0_14 = arith.constant 0 : index
    %c0_15 = arith.constant 0 : index
    %c0_16 = arith.constant 0 : index
    %10 = vector.load %arg3[%c0_14, %c0_15, %c0_16] : memref<7x16x8xf32, #tpu.memory_space<vmem>>, vector<7x16x8xf32>
    %c2 = arith.constant 2 : index
    %c0_17 = arith.constant 0 : index
    %c0_18 = arith.constant 0 : index
    %11 = tpu.strided_load %arg1[%c2, %c0_17, %c0_18] {strides = array<i32: 2, 1, 1>} : memref<16x16x8xf32, #tpu.memory_space<vmem>>, vector<7x16x8xf32>
    %cst_19 = arith.constant 0.274068624 : f32
    %12 = vector.broadcast %cst_19 : f32 to vector<7x16x8xf32>
    %13 = arith.mulf %12, %11 : vector<7x16x8xf32>
    %14 = arith.addf %10, %13 : vector<7x16x8xf32>
    %c0_20 = arith.constant 0 : index
    %c0_21 = arith.constant 0 : index
    %c0_22 = arith.constant 0 : index
    %15 = vector.load %arg3[%c0_20, %c0_21, %c0_22] : memref<7x16x8xf32, #tpu.memory_space<vmem>>, vector<7x16x8xf32>
    tpu.vector_store %arg3[%c0_20, %c0_21, %c0_22], %14 {strides = array<i32>} : memref<7x16x8xf32, #tpu.memory_space<vmem>>, vector<7x16x8xf32>,
    %c0_23 = arith.constant 0 : index
    %c0_24 = arith.constant 0 : index
    %c0_25 = arith.constant 0 : index
    %16 = tpu.strided_load %arg3[%c0_23, %c0_24, %c0_25] {strides = array<i32: 1, 2, 1>} : memref<7x16x8xf32, #tpu.memory_space<vmem>>, vector<7x7x8xf32>
    %cst_26 = arith.constant 0.274068624 : f32
    %17 = vector.broadcast %cst_26 : f32 to vector<7x7x8xf32>
    %18 = arith.mulf %17, %16 : vector<7x7x8xf32>
    %c0_27 = arith.constant 0 : index
    %c1_28 = arith.constant 1 : index
    %c0_29 = arith.constant 0 : index
    %19 = tpu.strided_load %arg3[%c0_27, %c1_28, %c0_29] {strides = array<i32: 1, 2, 1>} : memref<7x16x8xf32, #tpu.memory_space<vmem>>, vector<7x7x8xf32>
    %cst_30 = arith.constant 0.451862752 : f32
    %20 = vector.broadcast %cst_30 : f32 to vector<7x7x8xf32>
    %21 = arith.mulf %20, %19 : vector<7x7x8xf32>
    %22 = arith.addf %18, %21 : vector<7x7x8xf32>
    %c0_31 = arith.constant 0 : index
    %c2_32 = arith.constant 2 : index
    %c0_33 = arith.constant 0 : index
    %23 = tpu.strided_load %arg3[%c0_31, %c2_32, %c0_33] {strides = array<i32: 1, 2, 1>} : memref<7x16x8xf32, #tpu.memory_space<vmem>>, vector<7x7x8xf32>
    %cst_34 = arith.constant 0.274068624 : f32
    %24 = vector.broadcast %cst_34 : f32 to vector<7x7x8xf32>
    %25 = arith.mulf %24, %23 : vector<7x7x8xf32>
    %26 = arith.addf %22, %25 : vector<7x7x8xf32>
    %c0_35 = arith.constant 0 : index
    %c0_36 = arith.constant 0 : index
    %c0_37 = arith.constant 0 : index
    %27 = vector.load %arg2[%c0_35, %c0_36, %c0_37] : memref<7x7x8xf32, #tpu.memory_space<vmem>>, vector<7x7x8xf32>
    tpu.vector_store %arg2[%c0_35, %c0_36, %c0_37], %26 {strides = array<i32>} : memref<7x7x8xf32, #tpu.memory_space<vmem>>, vector<7x7x8xf32>,
    return
  }
  func.func @transform_0(%arg0: i32) -> (i32, i32, i32) {
    %c0_i32 = arith.constant 0 : i32
    %c0_i32_0 = arith.constant 0 : i32
    %c0_i32_1 = arith.constant 0 : i32
    return %c0_i32, %c0_i32_0, %arg0 : i32, i32, i32
  }
  func.func @transform_1(%arg0: i32) -> (i32, i32, i32) {
    %c0_i32 = arith.constant 0 : i32
    %c0_i32_0 = arith.constant 0 : i32
    %c0_i32_1 = arith.constant 0 : i32
    return %c0_i32, %c0_i32_0, %arg0 : i32, i32, i32
  }
}

</mosaic_0001>

<bundles_post_ra>
// kernel: tpu_custom_call.1
= control target key start
LH: loop header
LB: loop body
LE: loop exit
PB: predicated region body
PF: predicated region fallthrough
CT: control target
= control target key end

     0   :  { %vm37_vm0 = vcmask 64512   ;;  %s561_s0 = inlined_call_operand.vmem [shape: f32[16,16,8], index: 0, kind: input, shape index: {}]   ;;  %s562_s1 = inlined_call_operand.hbm [shape: f32[7,7,8], index: 1, kind: output, shape index: {}]  }
   0x1   :  { %v9_v0 = vld [vmem:[%s561_s0] sm:$0xff]  ;;  %v10_v1 = vld [vmem:[%s561_s0 + $0x8] sm:$0xff]  ;;  %v294_v26 = vld [vmem:[%s561_s0 + $0x10] sm:$0xff] }
   0x2   :  { %v11_v2 = vld [vmem:[%s561_s0 + $0x20] sm:$0xff]  ;;  %v23_v3 = vmul.f32 0.27406862, %v9_v0  ;;  %v24_v4 = vmul.f32 0.27406862, %v10_v1  ;;  %v12_v6 = vld [vmem:[%s561_s0 + $0x28] sm:$0xff] }
   0x3   :  { %v371_v5 = vmul.f32 0.27406862, %v11_v2  ;;  %v13_v7 = vld [vmem:[%s561_s0 + $0x40] sm:$0xff]  ;;  %v14_v8 = vld [vmem:[%s561_s0 + $0x48] sm:$0xff]  ;;  %v386_v9 = vmul.f32 0.27406862, %v12_v6 }
   0x4   :  { %38 = vst.msk [vmem:[#allocation2] sm:$0xff] %vm37_vm0, %v23_v3  ;;  %39 = vst.msk [vmem:[#allocation2 + $0x8] sm:$0xff] %vm37_vm0, %v24_v4  ;;  %v388_v10 = vmul.f32 0.27406862, %v13_v7  ;;  %v390_v11 = vmul.f32 0.27406862, %v14_v8 }
   0x5   :  { %40 = vst.msk [vmem:[#allocation2 + $0x10] sm:$0xff] %vm37_vm0, %v371_v5  ;;  %v15_v12 = vld [vmem:[%s561_s0 + $0x60] sm:$0xff]  ;;  %v16_v13 = vld [vmem:[%s561_s0 + $0x68] sm:$0xff]  ;;  %41 = vst.msk [vmem:[#allocation2 + $0x18] sm:$0xff] %vm37_vm0, %v386_v9  ;;  %v81_v29 = vmul.f32 0.45186275, %v294_v26 }
   0x6   :  { %v17_v14 = vld [vmem:[%s561_s0 + $0x80] sm:$0xff]  ;;  %42 = vst.msk [vmem:[#allocation2 + $0x20] sm:$0xff] %vm37_vm0, %v388_v10  ;;  %43 = vst.msk [vmem:[#allocation2 + $0x28] sm:$0xff] %vm37_vm0, %v390_v11  ;;  %v407_v15 = vmul.f32 0.27406862, %v15_v12  ;;  %v18_v18 = vld [vmem:[%s561_s0 + $0x88] sm:$0xff] }
   0x7   :  { %v409_v16 = vmul.f32 0.27406862, %v16_v13  ;;  %v411_v17 = vmul.f32 0.27406862, %v17_v14  ;;  %v19_v19 = vld [vmem:[%s561_s0 + $0xa0] sm:$0xff]  ;;  %v20_v20 = vld [vmem:[%s561_s0 + $0xa8] sm:$0xff] }
   0x8   :  { %44 = vst.msk [vmem:[#allocation2 + $0x30] sm:$0xff] %vm37_vm0, %v407_v15  ;;  %v428_v21 = vmul.f32 0.27406862, %v18_v18  ;;  %v430_v22 = vmul.f32 0.27406862, %v19_v19  ;;  %v21_v24 = vld [vmem:[%s561_s0 + $0xc0] sm:$0xff] }
   0x9   :  { %45 = vst.msk [vmem:[#allocation2 + $0x38] sm:$0xff] %vm37_vm0, %v409_v16  ;;  %46 = vst.msk [vmem:[#allocation2 + $0x40] sm:$0xff] %vm37_vm0, %v411_v17  ;;  %v432_v23 = vmul.f32 0.27406862, %v20_v20  ;;  %v22_v25 = vld [vmem:[%s561_s0 + $0xc8] sm:$0xff]  ;;  %v295_v32 = vld [vmem:[%s561_s0 + $0x18] sm:$0xff] }
   0xa   :  { %47 = vst.msk [vmem:[#allocation2 + $0x48] sm:$0xff] %vm37_vm0, %v428_v21  ;;  %48 = vst.msk [vmem:[#allocation2 + $0x50] sm:$0xff] %vm37_vm0, %v430_v22  ;;  %v449_v27 = vmul.f32 0.27406862, %v21_v24  ;;  %v451_v28 = vmul.f32 0.27406862, %v22_v25 }
   0xb   :  { %49 = vst.msk [vmem:[#allocation2 + $0x58] sm:$0xff] %vm37_vm0, %v432_v23  ;;  %v52_v30 = vld [vmem:[#allocation2] sm:$0xff]  ;;  %v53_v31 = vld [vmem:[#allocation2 + $0x8] sm:$0xff]  ;;  %v82_v34 = vmul.f32 0.45186275, %v295_v32  ;;  %v296_v36 = vld [vmem:[%s561_s0 + $0x30] sm:$0xff] }
   0xc   :  { %50 = vst.msk [vmem:[#allocation2 + $0x60] sm:$0xff] %vm37_vm0, %v449_v27  ;;  %51 = vst.msk [vmem:[#allocation2 + $0x68] sm:$0xff] %vm37_vm0, %v451_v28  ;;  %v95_v33 = vadd.f32 %v81_v29, %v52_v30  ;;  %v54_v35 = vld [vmem:[#allocation2 + $0x10] sm:$0xff]  ;;  %v297_v37 = vld [vmem:[%s561_s0 + $0x38] sm:$0xff]  ;;  %v83_v38 = vmul.f32 0.45186275, %v296_v36 }
   0xd   :  { %v55_v39 = vld [vmem:[#allocation2 + $0x18] sm:$0xff]  ;;  %v84_v40 = vmul.f32 0.45186275, %v297_v37  ;;  %v56_v41 = vld [vmem:[#allocation2 + $0x20] sm:$0xff]  ;;  %v96_v42 = vadd.f32 %v82_v34, %v53_v31  ;;  %v298_v43 = vld [vmem:[%s561_s0 + $0x50] sm:$0xff] }
   0xe   :  { %109 = vst.msk [vmem:[#allocation2] sm:$0xff] %vm37_vm0, %v95_v33  ;;  %v57_v44 = vld [vmem:[#allocation2 + $0x28] sm:$0xff]  ;;  %v299_v45 = vld [vmem:[%s561_s0 + $0x58] sm:$0xff]  ;;  %v97_v46 = vadd.f32 %v83_v38, %v54_v35  ;;  %v85_v48 = vmul.f32 0.45186275, %v298_v43  ;;  %v300_v51 = vld [vmem:[%s561_s0 + $0x70] sm:$0xff] }
   0xf   :  { %v98_v47 = vadd.f32 %v84_v40, %v55_v39  ;;  %v86_v49 = vmul.f32 0.45186275, %v299_v45  ;;  %v58_v50 = vld [vmem:[#allocation2 + $0x30] sm:$0xff]  ;;  %110 = vst.msk [vmem:[#allocation2 + $0x8] sm:$0xff] %vm37_vm0, %v96_v42  ;;  %v87_v52 = vmul.f32 0.45186275, %v300_v51 }
  0x10   :  { %v59_v53 = vld [vmem:[#allocation2 + $0x38] sm:$0xff]  ;;  %v60_v55 = vld [vmem:[#allocation2 + $0x40] sm:$0xff]  ;;  %111 = vst.msk [vmem:[#allocation2 + $0x10] sm:$0xff] %vm37_vm0, %v97_v46  ;;  %v99_v56 = vadd.f32 %v85_v48, %v56_v41  ;;  %v302_v59 = vld [vmem:[%s561_s0 + $0x90] sm:$0xff] }
  0x11   :  { %v301_v54 = vld [vmem:[%s561_s0 + $0x78] sm:$0xff]  ;;  %112 = vst.msk [vmem:[#allocation2 + $0x18] sm:$0xff] %vm37_vm0, %v98_v47  ;;  %v100_v57 = vadd.f32 %v86_v49, %v57_v44  ;;  %v61_v60 = vld [vmem:[#allocation2 + $0x48] sm:$0xff]  ;;  %v101_v62 = vadd.f32 %v87_v52, %v58_v50  ;;  %v89_v63 = vmul.f32 0.45186275, %v302_v59  ;;  %v62_v1 = vld [vmem:[#allocation2 + $0x50] sm:$0xff] }
  0x12   :  { %v88_v58 = vmul.f32 0.45186275, %v301_v54  ;;  %v303_v61 = vld [vmem:[%s561_s0 + $0x98] sm:$0xff]  ;;  %v304_v2 = vld [vmem:[%s561_s0 + $0xb0] sm:$0xff]  ;;  %113 = vst.msk [vmem:[#allocation2 + $0x20] sm:$0xff] %vm37_vm0, %v99_v56 }
  0x13   :  { %v90_v0 = vmul.f32 0.45186275, %v303_v61  ;;  %114 = vst.msk [vmem:[#allocation2 + $0x28] sm:$0xff] %vm37_vm0, %v100_v57  ;;  %v91_v4 = vmul.f32 0.45186275, %v304_v2  ;;  %v63_v6 = vld [vmem:[#allocation2 + $0x58] sm:$0xff]  ;;  %v103_v12 = vadd.f32 %v89_v63, %v60_v55 }
  0x14   :  { %v102_v3 = vadd.f32 %v88_v58, %v59_v53  ;;  %v305_v7 = vld [vmem:[%s561_s0 + $0xb8] sm:$0xff]  ;;  %v64_v8 = vld [vmem:[#allocation2 + $0x60] sm:$0xff]  ;;  %115 = vst.msk [vmem:[#allocation2 + $0x30] sm:$0xff] %vm37_vm0, %v101_v62  ;;  %v306_v18 = vld [vmem:[%s561_s0 + $0xd0] sm:$0xff] }
  0x15   :  { %v104_v13 = vadd.f32 %v90_v0, %v61_v60  ;;  %v92_v14 = vmul.f32 0.45186275, %v305_v7  ;;  %v65_v19 = vld [vmem:[#allocation2 + $0x68] sm:$0xff]  ;;  %v307_v20 = vld [vmem:[%s561_s0 + $0xd8] sm:$0xff]  ;;  %v105_v24 = vadd.f32 %v91_v4, %v62_v1  ;;  %v93_v25 = vmul.f32 0.45186275, %v306_v18 }
  0x16   :  { %116 = vst.msk [vmem:[#allocation2 + $0x38] sm:$0xff] %vm37_vm0, %v102_v3  ;;  %v94_v26 = vmul.f32 0.45186275, %v307_v20  ;;  %v123_v29 = vld [vmem:[#allocation2] sm:$0xff]  ;;  %117 = vst.msk [vmem:[#allocation2 + $0x40] sm:$0xff] %vm37_vm0, %v103_v12 }
  0x17   :  { %118 = vst.msk [vmem:[#allocation2 + $0x48] sm:$0xff] %vm37_vm0, %v104_v13  ;;  %v106_v30 = vadd.f32 %v92_v14, %v63_v6  ;;  %v166_v31 = vadd.f32 %v123_v29, %v371_v5 }
  0x18   :  { %6 = vsyncpa [#allocation4], 0  ;;  %119 = vst.msk [vmem:[#allocation2 + $0x50] sm:$0xff] %vm37_vm0, %v105_v24  ;;  %v107_v32 = vadd.f32 %v93_v25, %v64_v8  ;;  %v108_v33 = vadd.f32 %v94_v26, %v65_v19  ;;  %v124_v34 = vld [vmem:[#allocation2 + $0x8] sm:$0xff]  ;;  %v125_v36 = vld [vmem:[#allocation2 + $0x10] sm:$0xff]  ;;  %vm270_vm1 = vcmask 63488  }
  0x19   :  { %120 = vst.msk [vmem:[#allocation2 + $0x58] sm:$0xff] %vm37_vm0, %v106_v30  ;;  %180 = vst.msk [vmem:[#allocation2] sm:$0xff] %vm37_vm0, %v166_v31  ;;  %v167_v35 = vadd.f32 %v124_v34, %v386_v9  ;;  %v126_v37 = vld [vmem:[#allocation2 + $0x18] sm:$0xff]  ;;  %v168_v5 = vadd.f32 %v125_v36, %v388_v10  ;;  %v320_v39 = vld [vmem:[%s561_s0 + $0xe0] sm:$0xff] }
  0x1a   :  { %121 = vst.msk [vmem:[#allocation2 + $0x60] sm:$0xff] %vm37_vm0, %v107_v32  ;;  %122 = vst.msk [vmem:[#allocation2 + $0x68] sm:$0xff] %vm37_vm0, %v108_v33  ;;  %v169_v38 = vadd.f32 %v126_v37, %v390_v11  ;;  %v127_v40 = vld [vmem:[#allocation2 + $0x20] sm:$0xff]  ;;  %v128_v41 = vld [vmem:[#allocation2 + $0x28] sm:$0xff]  ;;  %v164_v48 = vmul.f32 0.27406862, %v320_v39 }
  0x1b   :  { %181 = vst.msk [vmem:[#allocation2 + $0x8] sm:$0xff] %vm37_vm0, %v167_v35  ;;  %v321_v9 = vld [vmem:[%s561_s0 + $0xe8] sm:$0xff]  ;;  %182 = vst.msk [vmem:[#allocation2 + $0x10] sm:$0xff] %vm37_vm0, %v168_v5  ;;  %v170_v10 = vadd.f32 %v127_v40, %v407_v15  ;;  %v171_v11 = vadd.f32 %v128_v41, %v409_v16  ;;  %v129_v42 = vld [vmem:[#allocation2 + $0x30] sm:$0xff]  ;;  %s349_s0 = smov [#allocation3]  }
  0x1c   :  { %183 = vst.msk [vmem:[#allocation2 + $0x18] sm:$0xff] %vm37_vm0, %v169_v38  ;;  %v172_v43 = vadd.f32 %v129_v42, %v411_v17  ;;  %v165_v49 = vmul.f32 0.27406862, %v321_v9  ;;  %s283_s8 = sshll.u32 %s349_s0, 4  ;;  %s284_s8 = int_to_ptr.vmem [resolvable:$true] %s283_s8 }
  0x1d   :  { %v130_v44 = vld [vmem:[#allocation2 + $0x38] sm:$0xff]  ;;  %184 = vst.msk [vmem:[#allocation2 + $0x20] sm:$0xff] %vm37_vm0, %v170_v10  ;;  %185 = vst.msk [vmem:[#allocation2 + $0x28] sm:$0xff] %vm37_vm0, %v171_v11  ;;  %v131_v46 = vld [vmem:[#allocation2 + $0x40] sm:$0xff]  ;;  %s325_s9 = scalar_lea.vmem %s284_s8, 896  ;;  %p330_p1 = scmp.lt.s32.totalorder %s284_s8, %s284_s8 }
  0x1e   :  { %v173_v45 = vadd.f32 %v130_v44, %v428_v21  ;;  %v132_v47 = vld [vmem:[#allocation2 + $0x48] sm:$0xff]  ;;  %186 = vst.msk [vmem:[#allocation2 + $0x30] sm:$0xff] %vm37_vm0, %v172_v43  ;;  %v174_v15 = vadd.f32 %v131_v46, %v430_v22  ;;  %p326_p0 = scmp.ne.s32.totalorder %s284_s8, %s325_s9  ;;  %p331_p2 = scmp.lt.s32.totalorder %s325_s9, %s325_s9 }
  0x1f   :  { %v175_v16 = vadd.f32 %v132_v47, %v432_v23  ;;  %v133_v50 = vld [vmem:[#allocation2 + $0x50] sm:$0xff] }
  0x20   :  { %187 = vst.msk [vmem:[#allocation2 + $0x38] sm:$0xff] %vm37_vm0, %v173_v45  ;;  %v176_v17 = vadd.f32 %v133_v50, %v449_v27  ;;  %v134_v51 = vld [vmem:[#allocation2 + $0x58] sm:$0xff]  ;;  %188 = vst.msk [vmem:[#allocation2 + $0x40] sm:$0xff] %vm37_vm0, %v174_v15  ;;  %p332_p3 = por %p331_p2, %p330_p1 }
  0x21   :  { %189 = vst.msk [vmem:[#allocation2 + $0x48] sm:$0xff] %vm37_vm0, %v175_v16  ;;  %v177_v21 = vadd.f32 %v134_v51, %v451_v28  ;;  %v135_v52 = vld [vmem:[#allocation2 + $0x60] sm:$0xff]  ;;  %v136_v53 = vld [vmem:[#allocation2 + $0x68] sm:$0xff] }
  0x22   :  { %190 = vst.msk [vmem:[#allocation2 + $0x50] sm:$0xff] %vm37_vm0, %v176_v17  ;;  %v178_v54 = vadd.f32 %v164_v48, %v135_v52  ;;  %v179_v22 = vadd.f32 %v165_v49, %v136_v53  ;;  %v194_v55 = vld [vmem:[#allocation2] ss:$2 sm:$0x7f]  ;;  %p333_p4 = pnand %p332_p3, %p326_p0 }
  0x23   :  { %v215_v23 = vld [vmem:[#allocation2 + $0x1] ss:$2 sm:$0x7f]  ;;  %191 = vst.msk [vmem:[#allocation2 + $0x58] sm:$0xff] %vm37_vm0, %v177_v21  ;;  %v207_v56 = vmul.f32 0.27406862, %v194_v55 }
  0x24   :  { %v228_v57 = vmul.f32 0.45186275, %v215_v23  ;;  %192 = vst.msk [vmem:[#allocation2 + $0x60] sm:$0xff] %vm37_vm0, %v178_v54  ;;  %193 = vst.msk [vmem:[#allocation2 + $0x68] sm:$0xff] %vm37_vm0, %v179_v22 }
  0x25   :  { %v243_v27 = vld [vmem:[#allocation2 + $0x2] ss:$2 sm:$0x7f]  ;;  %v196_v58 = vld [vmem:[#allocation2 + $0x10] ss:$2 sm:$0x7f] }
  0x26   :  { %v235_v59 = vadd.f32 %v228_v57, %v207_v56  ;;  %v256_v28 = vmul.f32 0.27406862, %v243_v27  ;;  %v208_v60 = vmul.f32 0.27406862, %v196_v58 }
  0x27   :  { %v217_v61 = vld [vmem:[#allocation2 + $0x11] ss:$2 sm:$0x7f]  ;;  %v245_v62 = vld [vmem:[#allocation2 + $0x12] ss:$2 sm:$0x7f] }
  0x28   :  { %v263_v63 = vadd.f32 %v256_v28, %v235_v59  ;;  %v229_v0 = vmul.f32 0.45186275, %v217_v61  ;;  %v198_v1 = vld [vmem:[#allocation2 + $0x20] ss:$2 sm:$0x7f] }
  0x29   :  { %v219_v2 = vld [vmem:[#allocation2 + $0x21] ss:$2 sm:$0x7f]  ;;  %v257_v4 = vmul.f32 0.27406862, %v245_v62 }
  0x2a   :  { %271 = vst.msk [vmem:[#allocation3] sm:$0x7f] %vm270_vm1, %v263_v63  ;;  %v236_v3 = vadd.f32 %v229_v0, %v208_v60  ;;  %v209_v6 = vmul.f32 0.27406862, %v198_v1  ;;  %v230_v7 = vmul.f32 0.45186275, %v219_v2 }
  0x2b   :  { %v247_v8 = vld [vmem:[#allocation2 + $0x22] ss:$2 sm:$0x7f]  ;;  %v200_v12 = vld [vmem:[#allocation2 + $0x30] ss:$2 sm:$0x7f] }
  0x2c   :  { %v264_v13 = vadd.f32 %v257_v4, %v236_v3  ;;  %v237_v14 = vadd.f32 %v230_v7, %v209_v6  ;;  %v258_v18 = vmul.f32 0.27406862, %v247_v8  ;;  %v210_v19 = vmul.f32 0.27406862, %v200_v12 }
  0x2d   :  { %v221_v20 = vld [vmem:[#allocation2 + $0x31] ss:$2 sm:$0x7f]  ;;  %v249_v24 = vld [vmem:[#allocation2 + $0x32] ss:$2 sm:$0x7f] }
  0x2e   :  { %272 = vst.msk [vmem:[#allocation3 + $0x8] sm:$0x7f] %vm270_vm1, %v264_v13  ;;  %v265_v25 = vadd.f32 %v258_v18, %v237_v14  ;;  %v231_v26 = vmul.f32 0.45186275, %v221_v20  ;;  %v259_v32 = vmul.f32 0.27406862, %v249_v24 }
  0x2f   :  { %v202_v29 = vld [vmem:[#allocation2 + $0x40] ss:$2 sm:$0x7f]  ;;  %v223_v30 = vld [vmem:[#allocation2 + $0x41] ss:$2 sm:$0x7f] }
  0x30   :  { %273 = vst.msk [vmem:[#allocation3 + $0x10] sm:$0x7f] %vm270_vm1, %v265_v25  ;;  %v238_v31 = vadd.f32 %v231_v26, %v210_v19  ;;  %v211_v33 = vmul.f32 0.27406862, %v202_v29  ;;  %v232_v34 = vmul.f32 0.45186275, %v223_v30 }
  0x31   :  { %v251_v35 = vld [vmem:[#allocation2 + $0x42] ss:$2 sm:$0x7f]  ;;  %v204_v36 = vld [vmem:[#allocation2 + $0x50] ss:$2 sm:$0x7f] }
  0x32   :  { %v266_v37 = vadd.f32 %v259_v32, %v238_v31  ;;  %v239_v5 = vadd.f32 %v232_v34, %v211_v33  ;;  %v260_v38 = vmul.f32 0.27406862, %v251_v35  ;;  %v212_v39 = vmul.f32 0.27406862, %v204_v36 }
  0x33   :  { %v225_v40 = vld [vmem:[#allocation2 + $0x51] ss:$2 sm:$0x7f]  ;;  %v253_v41 = vld [vmem:[#allocation2 + $0x52] ss:$2 sm:$0x7f] }
  0x34   :  { %274 = vst.msk [vmem:[#allocation3 + $0x18] sm:$0x7f] %vm270_vm1, %v266_v37  ;;  %v267_v9 = vadd.f32 %v260_v38, %v239_v5  ;;  %v233_v10 = vmul.f32 0.45186275, %v225_v40  ;;  %v261_v44 = vmul.f32 0.27406862, %v253_v41 }
  0x35   :  { %v206_v11 = vld [vmem:[#allocation2 + $0x60] ss:$2 sm:$0x7f]  ;;  %v227_v42 = vld [vmem:[#allocation2 + $0x61] ss:$2 sm:$0x7f] }
  0x36   :  { %275 = vst.msk [vmem:[#allocation3 + $0x20] sm:$0x7f] %vm270_vm1, %v267_v9  ;;  %v240_v43 = vadd.f32 %v233_v10, %v212_v39  ;;  %v213_v45 = vmul.f32 0.27406862, %v206_v11  ;;  %v234_v46 = vmul.f32 0.45186275, %v227_v42 }
  0x37   :  { %v255_v47 = vld [vmem:[#allocation2 + $0x62] ss:$2 sm:$0x7f] }
  0x38   :  { %v268_v48 = vadd.f32 %v261_v44, %v240_v43  ;;  %v241_v49 = vadd.f32 %v234_v46, %v213_v45  ;;  %v262_v15 = vmul.f32 0.27406862, %v255_v47 }
  0x3a   :  { %276 = vst.msk [vmem:[#allocation3 + $0x28] sm:$0x7f] %vm270_vm1, %v268_v48  ;;  %v269_v16 = vadd.f32 %v262_v15, %v241_v49 }
  0x3c   :  { %277 = vst.msk [vmem:[#allocation3 + $0x30] sm:$0x7f] %vm270_vm1, %v269_v16 }
  0x3d   :  { %336 = shalt.err (!%p333_p4)
}
  0x3e   :  { %s337_s12 = scalar_lea.hbm %s562_s1, 896 }
  0x3f   :  { %p338_p5 = scmp.ne.s32.totalorder %s562_s1, %s337_s12  ;;  %p341_p6 = scmp.lt.u32.totalorder %s337_s12, %s562_s1 }
  0x41   :  { %p343_p7 = pnand %p341_p6, %p338_p5 }
  0x43   :  { %346 = shalt.err (!%p343_p7)
}
  0x44   :  { %s350_s17 = smov 128   ;;  %s351_s18 = smov 8  }
  0x45   :  { %289 = dma.vmem_to_hbm [thread:$0]  %s284_s8, 896, %s562_s1, [#allocation4], %s350_s17, %s350_s17, %s351_s18  }
  0x46   :  { %347 = dma.done.wait [#allocation4], 896  }
  0x47   :  { %348 = vsyncadd [#allocation4], 4294966400 }
  0x48   :  { %293 = vsyncpa [#allocation4], 1 }

</bundles_post_ra>
